<compile_context>
chip_gen: v7x
topology: tpu7x:2x2x1
jax: 0.10.0
libtpu: 0.0.40
codegen_flags: <defaults>
</compile_context>

<pallas_src>
import functools

import jax
import jax.numpy as jnp
from jax.experimental import pallas as pl
from jax.experimental.pallas import tpu as pltpu

BERT_DIM = 768
HIDDEN = 64        # logical hidden size of the PyTorch module
HIDDEN_PAD = 128   # lane-aligned hidden size used inside the kernel
LANE = 128
SUBLANE = 8


def _round_up(n, m):
    return ((n + m - 1) // m) * m


def _pick_default_block_b():
    """Per-generation batch-tile default: amortize the ~0.35us/step pipeline
    overhead against each chip's HBM bandwidth (x read dominates)."""
    try:
        kind = jax.devices()[0].device_kind.lower()
    except Exception:
        return 1024
    if "v5 lite" in kind or "v5e" in kind or "v5litepod" in kind:
        return 512          # ~0.8 TB/s: 512 rows already ~1.9us DMA/step
    if "v6" in kind:
        return 1536         # ~1.4 TB/s
    if "v7" in kind:
        return 2048         # ~3.2 TB/s: need bigger tiles to hide fixed overhead
    return 1024


_DEFAULT_BLOCK_B = _pick_default_block_b()


def _mlp_kernel(x_ref, w1_ref, b1_ref, w2_ref, b2_ref, o_ref):
    # Fused MLP: two MXU matmuls + VPU bias-add/ReLU, all operands in VMEM.
    x = x_ref[...]                                                   # (bb, 768)
    h = jnp.dot(x, w1_ref[...], preferred_element_type=jnp.float32)  # (bb, 128)
    h = jnp.maximum(h + b1_ref[...], 0.0)
    out = jnp.dot(h, w2_ref[...], preferred_element_type=jnp.float32)
    out = out + b2_ref[...]                                          # (bb, nlabels)
    # Dropout(p=0.1) in eval mode == identity.
    o_ref[...] = out.astype(o_ref.dtype)


def pad_params(w1, b1, w2, b2):
    """One-time (init-time) lane-dense padding of the hidden dim: 64 -> 128.
    Bit-identical: padded hidden units get zero weights and a zero bias, so
    ReLU gives 0 and the zero rows of W2 add nothing."""
    w1 = jnp.asarray(w1, jnp.float32)
    b1 = jnp.asarray(b1, jnp.float32).reshape(1, HIDDEN)
    w2 = jnp.asarray(w2, jnp.float32)
    b2 = jnp.asarray(b2, jnp.float32).reshape(1, -1)
    nlabels = w2.shape[1]
    w1p = jnp.zeros((BERT_DIM, HIDDEN_PAD), jnp.float32).at[:, :HIDDEN].set(w1)
    b1p = jnp.zeros((1, HIDDEN_PAD), jnp.float32).at[:, :HIDDEN].set(b1)
    w2p = jnp.zeros((HIDDEN_PAD, nlabels), jnp.float32).at[:HIDDEN, :].set(w2)
    return w1p, b1p, w2p, b2


@functools.partial(jax.jit, static_argnames=("block_b",))
def classifier_forward(x, w1p, b1p, w2p, b2, *, block_b=_DEFAULT_BLOCK_B):
    """x: (B, 768) f32; padded params from pad_params(). Returns (B, nlabels)."""
    B, D = x.shape
    assert D == BERT_DIM
    nlabels = w2p.shape[1]

    # Batch tile: as big as block_b, but capped so the (parallel) batch axis
    # yields >=2 grid steps for moderate batches (v7x has 2 TensorCores).
    bb = min(block_b, _round_up(max(pl.cdiv(B, 2), 1), SUBLANE))
    bb = max(_round_up(bb, SUBLANE), SUBLANE)
    grid = (pl.cdiv(B, bb),)   # ragged edge block is masked by Pallas; no x copy

    # Advisory cost estimate so XLA schedules around this small call.
    flops = 2 * B * BERT_DIM * HIDDEN_PAD + 2 * B * HIDDEN_PAD * nlabels
    bytes_accessed = 4 * (B * BERT_DIM + BERT_DIM * HIDDEN_PAD + HIDDEN_PAD
                          + HIDDEN_PAD * nlabels + nlabels + B * nlabels)
    cost = pl.CostEstimate(flops=flops, transcendentals=0,
                           bytes_accessed=bytes_accessed)

    # Raise scoped VMEM only when big tiles actually need it (keeps the v5e
    # 16 MiB scoped default safe for the conservative tile picked there).
    itemsize = 4
    nl_lane = _round_up(nlabels, LANE)
    vmem_needed = itemsize * (
        2 * bb * BERT_DIM            # double-buffered x tiles
        + 2 * bb * nl_lane           # double-buffered out tiles (lane-padded in VMEM)
        + 2 * BERT_DIM * HIDDEN_PAD  # W1 buffers
        + 2 * HIDDEN_PAD * nl_lane   # W2 buffers
        + 4 * SUBLANE * LANE)        # biases (sublane-padded)
    vmem_limit = None
    if vmem_needed > (14 << 20):
        vmem_limit = min(vmem_needed + (8 << 20), 48 << 20)

    return pl.pallas_call(
        _mlp_kernel,
        out_shape=jax.ShapeDtypeStruct((B, nlabels), x.dtype),
        grid_spec=pltpu.PrefetchScalarGridSpec(
            num_scalar_prefetch=0,
            grid=grid,
            in_specs=[
                pl.BlockSpec((bb, BERT_DIM), lambda i: (i, 0)),          # x tile
                pl.BlockSpec((BERT_DIM, HIDDEN_PAD), lambda i: (0, 0)),  # W1 (resident)
                pl.BlockSpec((1, HIDDEN_PAD), lambda i: (0, 0)),         # b1
                pl.BlockSpec((HIDDEN_PAD, nlabels), lambda i: (0, 0)),   # W2
                pl.BlockSpec((1, nlabels), lambda i: (0, 0)),            # b2
            ],
            out_specs=pl.BlockSpec((bb, nlabels), lambda i: (i, 0)),     # true width
        ),
        compiler_params=pltpu.CompilerParams(
            dimension_semantics=("parallel",),
            vmem_limit_bytes=vmem_limit,
        ),
        cost_estimate=cost,
    )(x, w1p, b1p, w2p, b2)


def init_params(key, nlabels):
    """Deterministic init mimicking PyTorch nn.Linear: U(-1/sqrt(fan_in), +1/sqrt(fan_in))."""
    k1, k2, k3, k4 = jax.random.split(key, 4)
    lim1 = 1.0 / jnp.sqrt(jnp.float32(BERT_DIM))
    lim2 = 1.0 / jnp.sqrt(jnp.float32(HIDDEN))
    w1 = jax.random.uniform(k1, (BERT_DIM, HIDDEN), jnp.float32, -lim1, lim1)
    b1 = jax.random.uniform(k2, (1, HIDDEN), jnp.float32, -lim1, lim1)
    w2 = jax.random.uniform(k3, (HIDDEN, nlabels), jnp.float32, -lim2, lim2)
    b2 = jax.random.uniform(k4, (1, nlabels), jnp.float32, -lim2, lim2)
    return w1, b1, w2, b2


if __name__ == "__main__":
    key = jax.random.PRNGKey(0)
    kx, kp = jax.random.split(key)

    nlabels = 8
    w1, b1, w2, b2 = init_params(kp, nlabels)
    # One-time padding at init (hoisted out of the forward path).
    w1p, b1p, w2p, b2r = pad_params(w1, b1, w2, b2)

    # Small deterministic inputs; also exercise ragged / multi-block cases.
    x_all = jax.random.normal(kx, (37, BERT_DIM), jnp.float32)
    ref_all = jnp.maximum(x_all @ w1 + b1, 0.0) @ w2 + b2  # eval-mode dropout == id

    # Case 1: batch=8 (single block).
    x8 = x_all[:8]
    out8 = jax.block_until_ready(classifier_forward(x8, w1p, b1p, w2p, b2r))
    assert out8.shape == (8, nlabels)
    assert jnp.allclose(out8, ref_all[:8], atol=1e-4, rtol=1e-4)

    # Case 2: batch=5 (block bigger than batch -> masked edge block).
    x5 = x_all[:5]
    out5 = jax.block_until_ready(classifier_forward(x5, w1p, b1p, w2p, b2r))
    assert out5.shape == (5, nlabels)
    assert jnp.allclose(out5, ref_all[:5], atol=1e-4, rtol=1e-4)

    # Case 3: batch=37 (>=2 grid steps with a ragged final block, no x padding copy).
    out37 = jax.block_until_ready(classifier_forward(x_all, w1p, b1p, w2p, b2r))
    assert out37.shape == (37, nlabels)
    assert jnp.allclose(out37, ref_all, atol=1e-4, rtol=1e-4)

    print("KERNEL_OK")
</pallas_src>

<mosaic_0001>
module attributes {stable_mosaic.version = 11 : i64} {
  func.func @_mlp_kernel(%arg0: i32, %arg1: memref<8x768xf32, #tpu.memory_space<vmem>>, %arg2: memref<768x128xf32, #tpu.memory_space<vmem>>, %arg3: memref<1x128xf32, #tpu.memory_space<vmem>>, %arg4: memref<128x8xf32, #tpu.memory_space<vmem>>, %arg5: memref<1x8xf32, #tpu.memory_space<vmem>>, %arg6: memref<8x8xf32, #tpu.memory_space<vmem>>) attributes {dimension_semantics = [#tpu.dimension_semantics<parallel>], iteration_bounds = array<i64: 1>, scalar_prefetch = 0 : i64, scratch_operands = 0 : i64, tpu.core_type = #tpu.core_type<tc>, window_params = [{transform_indices = @transform_0, window_bounds = array<i64: 8, 768>}, {pipeline_mode = #tpu.pipeline_mode<synchronous>, transform_indices = @transform_1, window_bounds = array<i64: 768, 128>}, {pipeline_mode = #tpu.pipeline_mode<synchronous>, transform_indices = @transform_2, window_bounds = array<i64: 1, 128>}, {pipeline_mode = #tpu.pipeline_mode<synchronous>, transform_indices = @transform_3, window_bounds = array<i64: 128, 8>}, {pipeline_mode = #tpu.pipeline_mode<synchronous>, transform_indices = @transform_4, window_bounds = array<i64: 1, 8>}, {transform_indices = @transform_5, window_bounds = array<i64: 8, 8>}]} {
    %c0 = arith.constant 0 : index
    %c0_0 = arith.constant 0 : index
    %0 = vector.load %arg1[%c0, %c0_0] : memref<8x768xf32, #tpu.memory_space<vmem>>, vector<8x768xf32>
    %c0_1 = arith.constant 0 : index
    %c0_2 = arith.constant 0 : index
    %1 = vector.load %arg2[%c0_1, %c0_2] : memref<768x128xf32, #tpu.memory_space<vmem>>, vector<768x128xf32>
    %cst = arith.constant dense<0.000000e+00> : vector<8x128xf32>
    %2 = tpu.matmul %0, %1, %cst {dimension_numbers = #tpu.dot_dimension_numbers<[1], [0], [0], [1], [0, 0, 1, 1], [], []>} : vector<8x768xf32>, vector<768x128xf32>, vector<8x128xf32> -> vector<8x128xf32>
    %c0_3 = arith.constant 0 : index
    %c0_4 = arith.constant 0 : index
    %3 = vector.load %arg3[%c0_3, %c0_4] : memref<1x128xf32, #tpu.memory_space<vmem>>, vector<1x128xf32>
    %4 = vector.broadcast %3 : vector<1x128xf32> to vector<8x128xf32>
    %5 = arith.addf %2, %4 : vector<8x128xf32>
    %cst_5 = arith.constant 0.000000e+00 : f32
    %6 = vector.broadcast %cst_5 : f32 to vector<8x128xf32>
    %7 = arith.maximumf %5, %6 : vector<8x128xf32>
    %c0_6 = arith.constant 0 : index
    %c0_7 = arith.constant 0 : index
    %8 = vector.load %arg4[%c0_6, %c0_7] : memref<128x8xf32, #tpu.memory_space<vmem>>, vector<128x8xf32>
    %cst_8 = arith.constant dense<0.000000e+00> : vector<8x8xf32>
    %9 = tpu.matmul %7, %8, %cst_8 {dimension_numbers = #tpu.dot_dimension_numbers<[1], [0], [0], [1], [0, 0, 1, 1], [], []>} : vector<8x128xf32>, vector<128x8xf32>, vector<8x8xf32> -> vector<8x8xf32>
    %c0_9 = arith.constant 0 : index
    %c0_10 = arith.constant 0 : index
    %10 = vector.load %arg5[%c0_9, %c0_10] : memref<1x8xf32, #tpu.memory_space<vmem>>, vector<1x8xf32>
    %11 = vector.broadcast %10 : vector<1x8xf32> to vector<8x8xf32>
    %12 = arith.addf %9, %11 : vector<8x8xf32>
    %c0_11 = arith.constant 0 : index
    %c0_12 = arith.constant 0 : index
    %13 = vector.load %arg6[%c0_11, %c0_12] : memref<8x8xf32, #tpu.memory_space<vmem>>, vector<8x8xf32>
    tpu.vector_store %arg6[%c0_11, %c0_12], %12 {strides = array<i32>} : memref<8x8xf32, #tpu.memory_space<vmem>>, vector<8x8xf32>,
    return
  }
  func.func @transform_0(%arg0: i32) -> (i32, i32) {
    %c0_i32 = arith.constant 0 : i32
    %c0_i32_0 = arith.constant 0 : i32
    return %arg0, %c0_i32 : i32, i32
  }
  func.func @transform_1(%arg0: i32) -> (i32, i32) {
    %c0_i32 = arith.constant 0 : i32
    %c0_i32_0 = arith.constant 0 : i32
    %c0_i32_1 = arith.constant 0 : i32
    return %c0_i32, %c0_i32_0 : i32, i32
  }
  func.func @transform_2(%arg0: i32) -> (i32, i32) {
    %c0_i32 = arith.constant 0 : i32
    %c0_i32_0 = arith.constant 0 : i32
    %c0_i32_1 = arith.constant 0 : i32
    return %c0_i32, %c0_i32_0 : i32, i32
  }
  func.func @transform_3(%arg0: i32) -> (i32, i32) {
    %c0_i32 = arith.constant 0 : i32
    %c0_i32_0 = arith.constant 0 : i32
    %c0_i32_1 = arith.constant 0 : i32
    return %c0_i32, %c0_i32_0 : i32, i32
  }
  func.func @transform_4(%arg0: i32) -> (i32, i32) {
    %c0_i32 = arith.constant 0 : i32
    %c0_i32_0 = arith.constant 0 : i32
    %c0_i32_1 = arith.constant 0 : i32
    return %c0_i32, %c0_i32_0 : i32, i32
  }
  func.func @transform_5(%arg0: i32) -> (i32, i32) {
    %c0_i32 = arith.constant 0 : i32
    %c0_i32_0 = arith.constant 0 : i32
    return %arg0, %c0_i32 : i32, i32
  }
}

</mosaic_0001>

<bundles_post_ra>
// kernel: classifier_forward.1
= control target key start
LH: loop header
LB: loop body
LE: loop exit
PB: predicated region body
PF: predicated region fallthrough
CT: control target
= control target key end

     0   :  { %10 = vsyncpa [#allocation3], 0  ;;  %s932_s0 = inlined_call_operand.vmem [shape: f32[8,768], index: 0, kind: input, shape index: {}]   ;;  %s933_s1 = inlined_call_operand.hbm [shape: f32[768,128], index: 1, kind: input, shape index: {}]   ;;  %s934_s2 = inlined_call_operand.vmem [shape: f32[1,128], index: 2, kind: input, shape index: {}]   ;;  %s935_s3 = inlined_call_operand.vmem [shape: f32[128,8], index: 3, kind: input, shape index: {}]   ;;  %s936_s4 = inlined_call_operand.vmem [shape: f32[1,8], index: 4, kind: input, shape index: {}]   ;;  %s937_s5 = inlined_call_operand.hbm [shape: f32[8,8], index: 5, kind: output, shape index: {}]  }
   0x1   :  { %11 = vsyncpa [#allocation4], 0  ;;  %s799_s18 = smov [#allocation2]   ;;  %s751_s22 = scalar_lea.hbm %s933_s1, 12288 }
   0x2   :  { %s19_s19 = sshll.u32 %s799_s18, 4  ;;  %p752_p0 = scmp.ne.s32.totalorder %s933_s1, %s751_s22  ;;  %s20_s19 = int_to_ptr.vmem [resolvable:$true] %s19_s19 }
   0x3   :  { %p755_p1 = scmp.lt.u32.totalorder %s751_s22, %s933_s1 }
   0x5   :  { %p757_p2 = pnand %p755_p1, %p752_p0 }
   0x7   :  { %760 = shalt.err (!%p757_p2)
}
   0x8   :  { %s761_s27 = scalar_lea.vmem %s20_s19, 12288  ;;  %p766_p4 = scmp.lt.s32.totalorder %s20_s19, %s20_s19 }
   0x9   :  { %p762_p3 = scmp.ne.s32.totalorder %s20_s19, %s761_s27  ;;  %p767_p5 = scmp.lt.s32.totalorder %s761_s27, %s761_s27 }
   0xb   :  { %p768_p6 = por %p767_p5, %p766_p4 }
   0xd   :  { %p769_p7 = pnand %p768_p6, %p762_p3 }
   0xf   :  { %772 = shalt.err (!%p769_p7)
}
  0x10   :  { %s800_s28 = smov 128   ;;  %s801_s29 = smov 8  }
  0x11   :  { %25 = dma.hbm_to_vmem [thread:$0]  %s933_s1, 12288, %s20_s19, [#allocation3], %s800_s28, %s800_s28, %s801_s29  }
  0x12   :  { %795 = dma.done.wait [#allocation3], 12288  }
  0x13   :  { %796 = vsyncadd [#allocation3], 4294955008  ;;  %v57_v0 = vld [vmem:[#allocation2 + $0x80] sm:$0xff]  ;;  %v58_v1 = vld [vmem:[#allocation2 + $0x88] sm:$0xff]  ;;  %vm803_vm0 = vmmov 0   ;;  %vm448_vm1 = vcmask 64512  }
  0x14   :  { %v41_v2 = vld [vmem:[#allocation2] sm:$0xff]  ;;  %v624_v3 = vpack.c.bf16 %v58_v1, %v57_v0  ;;  %v42_v4 = vld [vmem:[#allocation2 + $0x8] sm:$0xff]  ;;  %v59_v11 = vld [vmem:[#allocation2 + $0x90] sm:$0xff] }
  0x15   :  { %v89_v5 = vld [vmem:[#allocation2 + $0x180] sm:$0xff]  ;;  %v90_v6 = vld [vmem:[#allocation2 + $0x188] sm:$0xff]  ;;  %v626_v7 = vpack.c.bf16 %v42_v4, %v41_v2  ;;  %v60_v13 = vld [vmem:[#allocation2 + $0x98] sm:$0xff] }
  0x16   :  { %v656_v8 = vpack.c.bf16 %v90_v6, %v89_v5  ;;  %v73_v9 = vld [vmem:[#allocation2 + $0x100] sm:$0xff]  ;;  %v74_v10 = vld [vmem:[#allocation2 + $0x108] sm:$0xff]  ;;  %625 = vmatprep.subr.bf16.mxu0 %v624_v3  ;;  %v43_v14 = vld [vmem:[#allocation2 + $0x10] sm:$0xff]  ;;  %v628_v16 = vpack.c.bf16 %v60_v13, %v59_v11 }
  0x17   :  { %v658_v12 = vpack.c.bf16 %v74_v10, %v73_v9  ;;  %v44_v15 = vld [vmem:[#allocation2 + $0x18] sm:$0xff]  ;;  %627 = vmatpush3.bf16.msra.mxu0 %v626_v7  ;;  %v91_v18 = vld [vmem:[#allocation2 + $0x190] sm:$0xff]  ;;  %v61_v23 = vld [vmem:[#allocation2 + $0xa0] sm:$0xff] }
  0x18   :  { %657 = vmatprep.subr.bf16.mxu1 %v656_v8  ;;  %v630_v17 = vpack.c.bf16 %v44_v15, %v43_v14  ;;  %v92_v19 = vld [vmem:[#allocation2 + $0x198] sm:$0xff]  ;;  %v75_v20 = vld [vmem:[#allocation2 + $0x110] sm:$0xff]  ;;  %v62_v24 = vld [vmem:[#allocation2 + $0xa8] sm:$0xff]  ;;  %629 = vmatprep.subr.bf16.mxu0 %v628_v16 }
  0x19   :  { %659 = vmatpush3.bf16.msra.mxu1 %v658_v12  ;;  %v660_v21 = vpack.c.bf16 %v92_v19, %v91_v18  ;;  %v76_v22 = vld [vmem:[#allocation2 + $0x118] sm:$0xff]  ;;  %v632_v26 = vpack.c.bf16 %v62_v24, %v61_v23  ;;  %v45_v27 = vld [vmem:[#allocation2 + $0x20] sm:$0xff]  ;;  %v46_v28 = vld [vmem:[#allocation2 + $0x28] sm:$0xff] }
  0x1a   :  { %v662_v25 = vpack.c.bf16 %v76_v22, %v75_v20  ;;  %v93_v29 = vld [vmem:[#allocation2 + $0x1a0] sm:$0xff]  ;;  %v94_v30 = vld [vmem:[#allocation2 + $0x1a8] sm:$0xff]  ;;  %v634_v33 = vpack.c.bf16 %v46_v28, %v45_v27  ;;  %v63_v35 = vld [vmem:[#allocation2 + $0xb0] sm:$0xff] }
  0x1b   :  { %661 = vmatprep.subr.bf16.mxu1 %v660_v21  ;;  %v77_v31 = vld [vmem:[#allocation2 + $0x120] sm:$0xff]  ;;  %v78_v32 = vld [vmem:[#allocation2 + $0x128] sm:$0xff]  ;;  %631 = vmatpush3.bf16.msra.mxu0 %v630_v17  ;;  %v664_v34 = vpack.c.bf16 %v94_v30, %v93_v29  ;;  %v64_v36 = vld [vmem:[#allocation2 + $0xb8] sm:$0xff] }
  0x1c   :  { %v47_v37 = vld [vmem:[#allocation2 + $0x30] sm:$0xff]  ;;  %633 = vmatprep.subr.bf16.mxu0 %v632_v26  ;;  %v666_v38 = vpack.c.bf16 %v78_v32, %v77_v31  ;;  %v636_v39 = vpack.c.bf16 %v64_v36, %v63_v35  ;;  %v48_v40 = vld [vmem:[#allocation2 + $0x38] sm:$0xff]  ;;  %v65_v46 = vld [vmem:[#allocation2 + $0xc0] sm:$0xff] }
  0x1d   :  { %663 = vmatpush3.bf16.msra.mxu1 %v662_v25  ;;  %v95_v41 = vld [vmem:[#allocation2 + $0x1b0] sm:$0xff]  ;;  %v96_v42 = vld [vmem:[#allocation2 + $0x1b8] sm:$0xff]  ;;  %v66_v47 = vld [vmem:[#allocation2 + $0xc8] sm:$0xff]  ;;  %v638_v48 = vpack.c.bf16 %v48_v40, %v47_v37 }
  0x1e   :  { %665 = vmatprep.subr.bf16.mxu1 %v664_v34  ;;  %v668_v43 = vpack.c.bf16 %v96_v42, %v95_v41  ;;  %v79_v44 = vld [vmem:[#allocation2 + $0x130] sm:$0xff]  ;;  %v80_v45 = vld [vmem:[#allocation2 + $0x138] sm:$0xff]  ;;  %v97_v49 = vld [vmem:[#allocation2 + $0x1c0] sm:$0xff]  ;;  %v640_v52 = vpack.c.bf16 %v66_v47, %v65_v46 }
  0x1f   :  { %635 = vmatpush3.bf16.msra.mxu0 %v634_v33  ;;  %v98_v50 = vld [vmem:[#allocation2 + $0x1c8] sm:$0xff]  ;;  %v670_v51 = vpack.c.bf16 %v80_v45, %v79_v44  ;;  %v49_v53 = vld [vmem:[#allocation2 + $0x40] sm:$0xff]  ;;  %v67_v58 = vld [vmem:[#allocation2 + $0xd0] sm:$0xff] }
  0x20   :  { %637 = vmatprep.subr.bf16.mxu0 %v636_v39  ;;  %v50_v54 = vld [vmem:[#allocation2 + $0x48] sm:$0xff]  ;;  %v81_v55 = vld [vmem:[#allocation2 + $0x140] sm:$0xff]  ;;  %v672_v56 = vpack.c.bf16 %v98_v50, %v97_v49  ;;  %v68_v59 = vld [vmem:[#allocation2 + $0xd8] sm:$0xff] }
  0x21   :  { %667 = vmatpush3.bf16.msra.mxu1 %v666_v38  ;;  %v82_v57 = vld [vmem:[#allocation2 + $0x148] sm:$0xff]  ;;  %v99_v60 = vld [vmem:[#allocation2 + $0x1d0] sm:$0xff]  ;;  %v100_v61 = vld [vmem:[#allocation2 + $0x1d8] sm:$0xff]  ;;  %v642_v62 = vpack.c.bf16 %v50_v54, %v49_v53  ;;  %v644_v0 = vpack.c.bf16 %v68_v59, %v67_v58 }
  0x22   :  { %669 = vmatprep.subr.bf16.mxu1 %v668_v43  ;;  %v674_v63 = vpack.c.bf16 %v82_v57, %v81_v55  ;;  %v51_v1 = vld [vmem:[#allocation2 + $0x50] sm:$0xff]  ;;  %v52_v2 = vld [vmem:[#allocation2 + $0x58] sm:$0xff]  ;;  %v676_v4 = vpack.c.bf16 %v100_v61, %v99_v60  ;;  %v69_v6 = vld [vmem:[#allocation2 + $0xe0] sm:$0xff] }
  0x23   :  { %639 = vmatpush3.bf16.msra.mxu0 %v638_v48  ;;  %v83_v3 = vld [vmem:[#allocation2 + $0x150] sm:$0xff]  ;;  %v84_v5 = vld [vmem:[#allocation2 + $0x158] sm:$0xff]  ;;  %v70_v7 = vld [vmem:[#allocation2 + $0xe8] sm:$0xff]  ;;  %v646_v10 = vpack.c.bf16 %v52_v2, %v51_v1 }
  0x24   :  { %641 = vmatprep.subr.bf16.mxu0 %v640_v52  ;;  %v101_v8 = vld [vmem:[#allocation2 + $0x1e0] sm:$0xff]  ;;  %v102_v9 = vld [vmem:[#allocation2 + $0x1e8] sm:$0xff]  ;;  %v678_v13 = vpack.c.bf16 %v84_v5, %v83_v3  ;;  %v648_v14 = vpack.c.bf16 %v70_v7, %v69_v6  ;;  %v71_v19 = vld [vmem:[#allocation2 + $0xf0] sm:$0xff] }
  0x25   :  { %671 = vmatpush3.bf16.msra.mxu1 %v670_v51  ;;  %v53_v11 = vld [vmem:[#allocation2 + $0x60] sm:$0xff]  ;;  %v36_v12 = vld [vmem:[%s932_s0 + $0x8] sm:$0xff]  ;;  %v680_v18 = vpack.c.bf16 %v102_v9, %v101_v8  ;;  %v72_v20 = vld [vmem:[#allocation2 + $0xf8] sm:$0xff] }
  0x26   :  { %673 = vmatprep.subr.bf16.mxu1 %v672_v56  ;;  %v54_v15 = vld [vmem:[#allocation2 + $0x68] sm:$0xff]  ;;  %v85_v16 = vld [vmem:[#allocation2 + $0x160] sm:$0xff]  ;;  %208 = vmatprep.mubr.f32.mxu0 %v36_v12  ;;  %v38_v21 = vld [vmem:[%s932_s0 + $0x18] sm:$0xff]  ;;  %v652_v26 = vpack.c.bf16 %v72_v20, %v71_v19 }
  0x27   :  { %643 = vmatpush3.bf16.msra.mxu0 %v642_v62  ;;  %v86_v17 = vld [vmem:[#allocation2 + $0x168] sm:$0xff]  ;;  %v103_v22 = vld [vmem:[#allocation2 + $0x1f0] sm:$0xff]  ;;  %v104_v23 = vld [vmem:[#allocation2 + $0x1f8] sm:$0xff]  ;;  %278 = vmatprep.mubr.f32.mxu1 %v38_v21  ;;  %v650_v24 = vpack.c.bf16 %v54_v15, %v53_v11 }
  0x28   :  { %645 = vmatprep.subr.bf16.mxu0 %v644_v0  ;;  %v682_v25 = vpack.c.bf16 %v86_v17, %v85_v16  ;;  %v55_v27 = vld [vmem:[#allocation2 + $0x70] sm:$0xff]  ;;  %v56_v28 = vld [vmem:[#allocation2 + $0x78] sm:$0xff]  ;;  %v684_v30 = vpack.c.bf16 %v104_v23, %v103_v22  ;;  %v121_v32 = vld [vmem:[#allocation2 + $0x280] sm:$0xff] }
  0x29   :  { %675 = vmatpush3.bf16.msra.mxu1 %v674_v63  ;;  %v87_v29 = vld [vmem:[#allocation2 + $0x170] sm:$0xff]  ;;  %v88_v31 = vld [vmem:[#allocation2 + $0x178] sm:$0xff]  ;;  %v122_v33 = vld [vmem:[#allocation2 + $0x288] sm:$0xff]  ;;  %v654_v34 = vpack.c.bf16 %v56_v28, %v55_v27 }
  0x2a   :  { %677 = vmatprep.subr.bf16.mxu1 %v676_v4  ;;  %v686_v35 = vpack.c.bf16 %v88_v31, %v87_v29  ;;  %v688_v36 = vpack.c.bf16 %v122_v33, %v121_v32  ;;  %v105_v37 = vld [vmem:[#allocation2 + $0x200] sm:$0xff]  ;;  %v106_v38 = vld [vmem:[#allocation2 + $0x208] sm:$0xff]  ;;  %v123_v39 = vld [vmem:[#allocation2 + $0x290] sm:$0xff] }
  0x2b   :  { %647 = vmatpush3.bf16.msra.mxu0 %v646_v10  ;;  %v124_v40 = vld [vmem:[#allocation2 + $0x298] sm:$0xff]  ;;  %v35_v41 = vld [vmem:[%s932_s0] sm:$0xff]  ;;  %v690_v42 = vpack.c.bf16 %v106_v38, %v105_v37  ;;  %v37_v43 = vld [vmem:[%s932_s0 + $0x10] sm:$0xff] }
  0x2c   :  { %649 = vmatprep.subr.bf16.mxu0 %v648_v14  ;;  %v692_v44 = vpack.c.bf16 %v124_v40, %v123_v39  ;;  %v107_v45 = vld [vmem:[#allocation2 + $0x210] sm:$0xff]  ;;  %v108_v46 = vld [vmem:[#allocation2 + $0x218] sm:$0xff]  ;;  %v125_v47 = vld [vmem:[#allocation2 + $0x2a0] sm:$0xff] }
  0x2d   :  { %679 = vmatpush3.bf16.msra.mxu1 %v678_v13  ;;  %v126_v48 = vld [vmem:[#allocation2 + $0x2a8] sm:$0xff]  ;;  %v694_v50 = vpack.c.bf16 %v108_v46, %v107_v45  ;;  %v109_v52 = vld [vmem:[#allocation2 + $0x220] sm:$0xff]  ;;  %v127_v54 = vld [vmem:[#allocation2 + $0x2b0] sm:$0xff] }
  0x2e   :  { %681 = vmatprep.subr.bf16.mxu1 %v680_v18  ;;  %v40_v49 = vld [vmem:[%s932_s0 + $0x28] sm:$0xff]  ;;  %v696_v51 = vpack.c.bf16 %v126_v48, %v125_v47  ;;  %v128_v55 = vld [vmem:[#allocation2 + $0x2b8] sm:$0xff]  ;;  %v111_v58 = vld [vmem:[#allocation2 + $0x230] sm:$0xff]  ;;  %v804_v47 = vmov 0.0  }
  0x2f   :  { %651 = vmatpush3.bf16.msra.mxu0 %v650_v24  ;;  %v110_v53 = vld [vmem:[#allocation2 + $0x228] sm:$0xff]  ;;  %v700_v57 = vpack.c.bf16 %v128_v55, %v127_v54  ;;  %v112_v59 = vld [vmem:[#allocation2 + $0x238] sm:$0xff]  ;;  %v129_v60 = vld [vmem:[#allocation2 + $0x2c0] sm:$0xff] }
  0x30   :  { %653 = vmatprep.subr.bf16.mxu0 %v652_v26  ;;  %v698_v56 = vpack.c.bf16 %v110_v53, %v109_v52  ;;  %v130_v61 = vld [vmem:[#allocation2 + $0x2c8] sm:$0xff]  ;;  %v702_v62 = vpack.c.bf16 %v112_v59, %v111_v58  ;;  %v113_v0 = vld [vmem:[#allocation2 + $0x240] sm:$0xff]  ;;  %v131_v2 = vld [vmem:[#allocation2 + $0x2d0] sm:$0xff] }
  0x31   :  { %683 = vmatpush3.bf16.msra.mxu1 %v682_v25  ;;  %v704_v63 = vpack.c.bf16 %v130_v61, %v129_v60  ;;  %v114_v1 = vld [vmem:[#allocation2 + $0x248] sm:$0xff]  ;;  %v132_v3 = vld [vmem:[#allocation2 + $0x2d8] sm:$0xff]  ;;  %v115_v6 = vld [vmem:[#allocation2 + $0x250] sm:$0xff]  ;;  %v802_v25 = vmov 0.0|0.0  }
  0x32   :  { %685 = vmatprep.subr.bf16.mxu1 %v684_v30  ;;  %v706_v4 = vpack.c.bf16 %v114_v1, %v113_v0  ;;  %v708_v5 = vpack.c.bf16 %v132_v3, %v131_v2  ;;  %v116_v7 = vld [vmem:[#allocation2 + $0x258] sm:$0xff]  ;;  %v133_v8 = vld [vmem:[#allocation2 + $0x2e0] sm:$0xff]  ;;  %v134_v9 = vld [vmem:[#allocation2 + $0x2e8] sm:$0xff] }
  0x33   :  { %655 = vmatpush3.bf16.msra.mxu0 %v654_v34  ;;  %v710_v10 = vpack.c.bf16 %v116_v7, %v115_v6  ;;  %v712_v11 = vpack.c.bf16 %v134_v9, %v133_v8  ;;  %v117_v12 = vld [vmem:[#allocation2 + $0x260] sm:$0xff]  ;;  %v118_v13 = vld [vmem:[#allocation2 + $0x268] sm:$0xff]  ;;  %v135_v14 = vld [vmem:[#allocation2 + $0x2f0] sm:$0xff] }
  0x34   :  { %689 = vmatprep.subr.bf16.mxu0 %v688_v36  ;;  %v136_v15 = vld [vmem:[#allocation2 + $0x2f8] sm:$0xff]  ;;  %v714_v16 = vpack.c.bf16 %v118_v13, %v117_v12  ;;  %v119_v18 = vld [vmem:[#allocation2 + $0x270] sm:$0xff]  ;;  %v39_v21 = vld [vmem:[%s932_s0 + $0x20] sm:$0xff]  ;;  %s805_s0 = smov [#allocation5]  }
  0x35   :  { %687 = vmatpush3.bf16.msra.mxu1 %v686_v35  ;;  %v716_v17 = vpack.c.bf16 %v136_v15, %v135_v14  ;;  %v120_v19 = vld [vmem:[#allocation2 + $0x278] sm:$0xff]  ;;  %v355_v22 = vld [vmem:[%s935_s3] sm:$0xff]  ;;  %v356_v23 = vld [vmem:[%s935_s3 + $0x8] sm:$0xff]  ;;  %s456_s26 = sshll.u32 %s805_s0, 4  ;;  %s457_s26 = int_to_ptr.vmem [resolvable:$true] %s456_s26 }
  0x36   :  { %209 = vmatmul.mubr.f32.vlgmr.msra.gmra.mrb[0].mxu0 %v35_v41  ;;  %v718_v20 = vpack.c.bf16 %v120_v19, %v119_v18  ;;  %v357_v24 = vld [vmem:[%s935_s3 + $0x10] sm:$0xff]  ;;  %720 = vmatprep.subr.bf16.mxu1 %v802_v25  ;;  %v721_v26 = vpack.c.bf16 %v356_v23, %v355_v22  ;;  %v358_v27 = vld [vmem:[%s935_s3 + $0x18] sm:$0xff]  ;;  %v359_v29 = vld [vmem:[%s935_s3 + $0x20] sm:$0xff]  ;;  %p778_p9 = scmp.lt.s32.totalorder %s457_s26, %s457_s26 }
  0x37   :  { %691 = vmatpush3.bf16.msra.mxu0 %v690_v42  ;;  %348 = vmatprep.mubr.f32.mxu0 %v40_v49  ;;  %v724_v28 = vpack.c.bf16 %v358_v27, %v357_v24  ;;  %v360_v30 = vld [vmem:[%s935_s3 + $0x28] sm:$0xff]  ;;  %v361_v32 = vld [vmem:[%s935_s3 + $0x30] sm:$0xff]  ;;  %v362_v33 = vld [vmem:[%s935_s3 + $0x38] sm:$0xff] }
  0x38   :  { %279 = vmatmul.mubr.f32.vlgmr.msra.gmra.mrb[0].mxu1 %v37_v43  ;;  %693 = vmatprep.subr.bf16.mxu0 %v692_v44  ;;  %v727_v31 = vpack.c.bf16 %v360_v30, %v359_v29  ;;  %v730_v34 = vpack.c.bf16 %v362_v33, %v361_v32  ;;  %v363_v35 = vld [vmem:[%s935_s3 + $0x40] sm:$0xff]  ;;  %v364_v36 = vld [vmem:[%s935_s3 + $0x48] sm:$0xff]  ;;  %v365_v38 = vld [vmem:[%s935_s3 + $0x50] sm:$0xff] }
  0x39   :  { %722 = vmatpush3.bf16.msra.mxu1 %v721_v26  ;;  %v733_v37 = vpack.c.bf16 %v364_v36, %v363_v35  ;;  %v366_v39 = vld [vmem:[%s935_s3 + $0x58] sm:$0xff]  ;;  %v367_v41 = vld [vmem:[%s935_s3 + $0x60] sm:$0xff]  ;;  %v368_v42 = vld [vmem:[%s935_s3 + $0x68] sm:$0xff]  ;;  %621 = vmatprep.mubr.msk.f32.mxu1 %vm803_vm0, %v804_v47 }
  0x3a   :  { %723 = vmatprep.subr.bf16.mxu1 %v802_v25  ;;  %v736_v40 = vpack.c.bf16 %v366_v39, %v365_v38  ;;  %v739_v43 = vpack.c.bf16 %v368_v42, %v367_v41  ;;  %v369_v44 = vld [vmem:[%s935_s3 + $0x70] sm:$0xff]  ;;  %v370_v45 = vld [vmem:[%s935_s3 + $0x78] sm:$0xff]  ;;  %v465_v49 = vld [vmem:[%s934_s2] ss:$0 sm:$0xff]  ;;  %s773_s2 = scalar_lea.vmem %s457_s26, 128 }
  0x3b   :  { %695 = vmatpush3.bf16.msra.mxu0 %v694_v50  ;;  %v742_v46 = vpack.c.bf16 %v370_v45, %v369_v44  ;;  %p774_p8 = scmp.ne.s32.totalorder %s457_s26, %s773_s2  ;;  %p779_p10 = scmp.lt.s32.totalorder %s773_s2, %s773_s2 }
  0x3c   :  { %697 = vmatprep.subr.bf16.mxu0 %v696_v51 }
  0x3d   :  { %725 = vmatpush3.bf16.msra.mxu1 %v724_v28  ;;  %p780_p11 = por %p779_p10, %p778_p9 }
  0x3e   :  { %726 = vmatprep.subr.bf16.mxu1 %v802_v25 }
  0x3f   :  { %699 = vmatpush3.bf16.msra.mxu0 %v698_v56  ;;  %p781_p12 = pnand %p780_p11, %p774_p8 }
  0x40   :  { %701 = vmatprep.subr.bf16.mxu0 %v700_v57 }
  0x41   :  { %728 = vmatpush3.bf16.msra.mxu1 %v727_v31 }
  0x42   :  { %729 = vmatprep.subr.bf16.mxu1 %v802_v25 }
  0x43   :  { %703 = vmatpush3.bf16.msra.mxu0 %v702_v62  ;;  %v466_v62 = vld [vmem:[%s936_s4] ss:$0 sm:$0xff] }
  0x44   :  { %705 = vmatprep.subr.bf16.mxu0 %v704_v63 }
  0x45   :  { %731 = vmatpush3.bf16.msra.mxu1 %v730_v34 }
  0x46   :  { %732 = vmatprep.subr.bf16.mxu1 %v802_v25 }
  0x47   :  { %707 = vmatpush3.bf16.msra.mxu0 %v706_v4 }
  0x48   :  { %709 = vmatprep.subr.bf16.mxu0 %v708_v5 }
  0x49   :  { %734 = vmatpush3.bf16.msra.mxu1 %v733_v37 }
  0x4a   :  { %735 = vmatprep.subr.bf16.mxu1 %v802_v25 }
  0x4b   :  { %711 = vmatpush3.bf16.msra.mxu0 %v710_v10 }
  0x4c   :  { %713 = vmatprep.subr.bf16.mxu0 %v712_v11 }
  0x4d   :  { %737 = vmatpush3.bf16.msra.mxu1 %v736_v40 }
  0x4e   :  { %738 = vmatprep.subr.bf16.mxu1 %v802_v25 }
  0x4f   :  { %715 = vmatpush3.bf16.msra.mxu0 %v714_v16 }
  0x50   :  { %717 = vmatprep.subr.bf16.mxu0 %v716_v17 }
  0x51   :  { %740 = vmatpush3.bf16.msra.mxu1 %v739_v43 }
  0x52   :  { %741 = vmatprep.subr.bf16.mxu1 %v802_v25 }
  0x53   :  { %719 = vmatpush3.bf16.msra.mxu0 %v718_v20 }
  0x55   :  { %743 = vmatpush3.bf16.msra.mxu1 %v742_v46 }
  0x56   :  { %349 = vmatmul.mubr.f32.vlgmr.msra.gmra.mrb[2].mxu0 %v39_v21 }
 0x109   :  { %v499_v48 = vpop.f32.mrb[0].mxu0 }
 0x10a   :  { %v500_v50 = vpop.f32.mrb[1].mxu0 }
 0x10b   :  { %v534_v51 = vpop.f32.mrb[0].mxu1  ;;  %v501_v52 = vadd.f32 %v500_v50, %v499_v48 }
 0x10c   :  { %v535_v53 = vpop.f32.mrb[1].mxu1 }
 0x10d   :  { %v536_v54 = vadd.f32 %v535_v53, %v534_v51  ;;  %v211_v55 = vadd.f32 %v501_v52, %v465_v49 }
 0x10f   :  { %v281_v56 = vadd.f32 %v536_v54, %v211_v55 }
 0x129   :  { %v569_v57 = vpop.f32.mrb[2].mxu0 }
 0x12a   :  { %v570_v58 = vpop.f32.mrb[3].mxu0 }
 0x12b   :  { %v571_v59 = vadd.f32 %v570_v58, %v569_v57 }
 0x12d   :  { %v351_v60 = vadd.f32 %v571_v59, %v281_v56 }
 0x12f   :  { %v354_v61 = vmax.f32 %v351_v60, 0.0 }
 0x131   :  { %622 = vmatmul.mubr.f32.vlgmr.msra.gmra.mrb[2].mxu1 %v354_v61 }
 0x204   :  { %v444_v63 = vpop.f32.mrb[2].mxu1 }
 0x205   :  { %v445_v0 = vadd.f32 %v466_v62, %v444_v63  ;;  %v623_v1 = vpop.f32.mrb[3].mxu1 }
 0x207   :  { %449 = vst.msk [vmem:[#allocation5] sm:$0xff] %vm448_vm1, %v445_v0 }
 0x208   :  { %784 = shalt.err (!%p781_p12)
}
 0x209   :  { %s785_s29 = scalar_lea.hbm %s937_s5, 128 }
 0x20a   :  { %p786_p13 = scmp.ne.s32.totalorder %s937_s5, %s785_s29  ;;  %p789_p0 = scmp.lt.u32.totalorder %s785_s29, %s937_s5 }
 0x20c   :  { %p791_p1 = pnand %p789_p0, %p786_p13 }
 0x20e   :  { %794 = shalt.err (!%p791_p1)
}
 0x20f   :  { %459 = dma.vmem_to_hbm [thread:$0]  %s457_s26, 128, %s937_s5, [#allocation4]  }
 0x210   :  { %797 = dma.done.wait [#allocation4], 128  }
 0x211   :  { %798 = vsyncadd [#allocation4], 4294967168 }
 0x212   :  { %463 = vsyncpa [#allocation3], 1 }
 0x213   :  { %464 = vsyncpa [#allocation4], 1 }

</bundles_post_ra>
